<compile_context>
chip_gen: v7x
topology: tpu7x:2x2x1
jax: 0.10.0
libtpu: 0.0.40
codegen_flags: <defaults>
</compile_context>

<pallas_src>
import functools

import jax
import jax.numpy as jnp
from jax.experimental import pallas as pl
from jax.experimental.pallas import tpu as pltpu


def _channel_attention_kernel(x_ref, w1t_ref, w2t_ref, o_ref, sum_sc, max_sc,
                              *, hw, th):
    # x_ref:   (1, C, th)   spatial chunk of one batch row of the reshaped input
    # w1t_ref: (C, Cr)      fc1 weight, transposed (1x1 conv as matmul)
    # w2t_ref: (Cr, C)      fc2 weight, transposed
    # o_ref:   (1, 1, C)    sigmoid(channel attention) for this batch row
    # sum_sc:  (1, C) f32   running spatial sum  (accumulator scratch)
    # max_sc:  (1, C) f32   running spatial max  (accumulator scratch)
    j = pl.program_id(1)
    last = pl.num_programs(1) - 1

    @pl.when(j == 0)
    def _init():
        sum_sc[...] = jnp.zeros_like(sum_sc)
        max_sc[...] = jnp.full_like(max_sc, -jnp.inf)

    xb = x_ref[...].astype(jnp.float32)                        # (1, C, th)

    ragged = (hw % th) != 0                                    # static Python bool
    if not ragged:
        # Every chunk is full: bare accumulate only (HBM-roofline path).
        sum_sc[...] += jnp.sum(xb, axis=-1)
        max_sc[...] = jnp.maximum(max_sc[...], jnp.max(xb, axis=-1))
    else:
        # Full chunks: no masking work at all.
        @pl.when(j != last)
        def _full():
            sum_sc[...] += jnp.sum(xb, axis=-1)
            max_sc[...] = jnp.maximum(max_sc[...], jnp.max(xb, axis=-1))

        # Ragged last chunk: out-of-range tail of the VMEM tile is unspecified
        # data, so mask it (0 for the sum, -inf for the max).
        @pl.when(j == last)
        def _tail():
            pos = j * th + jax.lax.broadcasted_iota(jnp.int32, xb.shape, 2)
            valid = pos < hw
            sum_sc[...] += jnp.sum(jnp.where(valid, xb, 0.0), axis=-1)
            max_sc[...] = jnp.maximum(
                max_sc[...], jnp.max(jnp.where(valid, xb, -jnp.inf), axis=-1))

    @pl.when(j == last)
    def _finalize():
        avg = sum_sc[...] * (1.0 / hw)                         # (1, C)
        mx = max_sc[...]                                       # (1, C)
        w1t = w1t_ref[...]                                     # (C, Cr)
        w2t = w2t_ref[...]                                     # (Cr, C)
        h_avg = jnp.maximum(
            jnp.dot(avg, w1t, preferred_element_type=jnp.float32), 0.0)
        h_max = jnp.maximum(
            jnp.dot(mx, w1t, preferred_element_type=jnp.float32), 0.0)
        logits = (jnp.dot(h_avg, w2t, preferred_element_type=jnp.float32)
                  + jnp.dot(h_max, w2t, preferred_element_type=jnp.float32))
        att = 1.0 / (1.0 + jnp.exp(-logits))                   # (1, C)
        o_ref[...] = att.reshape(o_ref.shape).astype(o_ref.dtype)


def _default_tile_bytes():
    """Per-generation input-tile budget (Pallas double-buffers this)."""
    try:
        kind = jax.devices()[0].device_kind.lower()
    except Exception:
        return 4 << 20
    if "v7" in kind:
        return 12 << 20   # ~3.2 TB/s per TC: bigger tiles amortize step cost
    if "v6" in kind:
        return 8 << 20    # 512+ lane tiles already ~85% of roofline on v6e
    return 4 << 20        # v5e: 16 MiB scoped-VMEM default; stay small


def channel_attention(x_nchw, fc1_weight, fc2_weight, *, max_tile_bytes=None):
    """ChannelAttention forward.

    x_nchw:     [N, C, H, W]
    fc1_weight: [C//ratio, C, 1, 1]  (Conv2d 1x1, bias=False)
    fc2_weight: [C, C//ratio, 1, 1]  (Conv2d 1x1, bias=False)
    returns sigmoid attention of shape [N, C, 1, 1].
    """
    N, C, H, W = x_nchw.shape
    Cr = fc1_weight.shape[0]
    assert fc1_weight.shape[:2] == (Cr, C)
    assert fc2_weight.shape[:2] == (C, Cr)
    HW = H * W

    if max_tile_bytes is None:
        max_tile_bytes = _default_tile_bytes()

    x = x_nchw.reshape(N, C, HW)            # free reshape; HW on the lane axis

    # Spatial chunk: the largest 128-multiple fitting the budget, or all of HW
    # when it fits (a full-extent block needs no masking and no 128 alignment).
    itemsize = x.dtype.itemsize
    per_pos_bytes = C * itemsize                                # block = (1, C, th)
    th_budget = max(128, (max_tile_bytes // per_pos_bytes) // 128 * 128)
    # TODO(synk): for extreme channel counts (C*128*itemsize*2 > scoped VMEM)
    # split C onto a grid axis; not needed at realistic ChannelAttention widths.
    th = HW if HW <= th_budget else th_budget
    n_chunks = pl.cdiv(HW, th)
    grid = (N, n_chunks)

    # 1x1 convs as pre-transposed matmul operands.
    w1t = fc1_weight.reshape(Cr, C).T.astype(jnp.float32)       # (C, Cr)
    w2t = fc2_weight.reshape(C, Cr).T.astype(jnp.float32)       # (Cr, C)

    # Scoped-VMEM limit derived from the actual footprint (with headroom).
    tile_bytes = C * th * itemsize
    w_bytes = 2 * (C * Cr) * 4
    footprint = 2 * tile_bytes + 2 * w_bytes + 4 * C * 4 + (1 << 20)
    vmem_limit = int(min(max(int(footprint * 1.5), 32 << 20), 48 << 20))

    kernel = functools.partial(_channel_attention_kernel, hw=HW, th=th)

    out = pl.pallas_call(
        kernel,
        out_shape=jax.ShapeDtypeStruct((N, 1, C), jnp.float32),
        grid_spec=pltpu.PrefetchScalarGridSpec(
            num_scalar_prefetch=0,
            grid=grid,
            in_specs=[
                pl.BlockSpec((1, C, th), lambda n, j: (n, 0, j)),
                pl.BlockSpec((C, Cr), lambda n, j: (0, 0)),
                pl.BlockSpec((Cr, C), lambda n, j: (0, 0)),
            ],
            out_specs=pl.BlockSpec((1, 1, C), lambda n, j: (n, 0, 0)),
            scratch_shapes=[
                pltpu.VMEM((1, C), jnp.float32),                # running sum
                pltpu.VMEM((1, C), jnp.float32),                # running max
            ],
        ),
        compiler_params=pltpu.CompilerParams(
            # Batch axis is independent (megacore-parallel on v7x); the spatial
            # axis carries the accumulators -> arbitrary.
            dimension_semantics=("parallel", "arbitrary"),
            vmem_limit_bytes=vmem_limit),
    )(x, w1t, w2t)

    return out.reshape(N, C, 1, 1)


def _reference(x, fc1_w, fc2_w):
    N, C, H, W = x.shape
    Cr = fc1_w.shape[0]
    w1 = fc1_w.reshape(Cr, C)
    w2 = fc2_w.reshape(C, Cr)
    avg = jnp.mean(x, axis=(2, 3))                              # [N, C]
    mx = jnp.max(x, axis=(2, 3))                                # [N, C]

    def mlp(v):
        return jnp.maximum(v @ w1.T, 0.0) @ w2.T

    out = jax.nn.sigmoid(mlp(avg) + mlp(mx))
    return out.reshape(N, C, 1, 1)


if __name__ == "__main__":
    key = jax.random.PRNGKey(0)
    k_x1, k_x2, k_w1, k_w2 = jax.random.split(key, 4)

    # ChannelAttention(in_planes=32, ratio=8).
    N, C, ratio = 2, 32, 8
    Cr = C // ratio

    fc1_w = jax.random.normal(k_w1, (Cr, C, 1, 1), dtype=jnp.float32) * 0.2
    fc2_w = jax.random.normal(k_w2, (C, Cr, 1, 1), dtype=jnp.float32) * 0.2

    fn = jax.jit(channel_attention, static_argnames=("max_tile_bytes",))

    # Case 1: default tiling -> single full-HW chunk per batch row.
    x1 = jax.random.normal(k_x1, (N, C, 16, 16), dtype=jnp.float32)
    out1 = jax.block_until_ready(fn(x1, fc1_w, fc2_w))
    ref1 = _reference(x1, fc1_w, fc2_w)
    assert out1.shape == (N, C, 1, 1)
    assert jnp.allclose(out1, ref1, atol=1e-4, rtol=1e-4)

    # Case 2: tiny tile budget -> multi-chunk spatial reduction with a ragged,
    # masked last chunk (17*17 = 289 = 2*128 + 33).
    x2 = jax.random.normal(k_x2, (N, C, 17, 17), dtype=jnp.float32)
    out2 = jax.block_until_ready(fn(x2, fc1_w, fc2_w, max_tile_bytes=16 << 10))
    ref2 = _reference(x2, fc1_w, fc2_w)
    assert out2.shape == (N, C, 1, 1)
    assert jnp.allclose(out2, ref2, atol=1e-4, rtol=1e-4)

    print("KERNEL_OK")
</pallas_src>

<mosaic_0001>
module attributes {stable_mosaic.version = 11 : i64} {
  func.func @_channel_attention_kernel(%arg0: i32, %arg1: i32, %arg2: memref<1x32x256xf32, #tpu.memory_space<vmem>>, %arg3: memref<32x4xf32, #tpu.memory_space<vmem>>, %arg4: memref<4x32xf32, #tpu.memory_space<vmem>>, %arg5: memref<1x1x32xf32, #tpu.memory_space<vmem>>, %arg6: memref<1x32xf32, #tpu.memory_space<vmem>>, %arg7: memref<1x32xf32, #tpu.memory_space<vmem>>) attributes {dimension_semantics = [#tpu.dimension_semantics<parallel>, #tpu.dimension_semantics<arbitrary>], iteration_bounds = array<i64: 2, 1>, scalar_prefetch = 0 : i64, scratch_operands = 2 : i64, tpu.core_type = #tpu.core_type<tc>, window_params = [{transform_indices = @transform_0, window_bounds = array<i64: 1, 32, 256>}, {pipeline_mode = #tpu.pipeline_mode<synchronous>, transform_indices = @transform_1, window_bounds = array<i64: 32, 4>}, {pipeline_mode = #tpu.pipeline_mode<synchronous>, transform_indices = @transform_2, window_bounds = array<i64: 4, 32>}, {transform_indices = @transform_3, window_bounds = array<i64: 1, 1, 32>}]} {
    %c0_i32 = arith.constant 0 : i32
    %0 = arith.cmpi eq, %arg1, %c0_i32 : i32
    %1 = arith.extui %0 : i1 to i32
    %c0_i32_0 = arith.constant 0 : i32
    %2 = arith.cmpi ne, %1, %c0_i32_0 : i32
    scf.if %2 {
      %cst_14 = arith.constant 0.000000e+00 : f32
      %15 = vector.broadcast %cst_14 : f32 to vector<1x32xf32>
      %c0_15 = arith.constant 0 : index
      %c0_16 = arith.constant 0 : index
      %16 = vector.load %arg6[%c0_15, %c0_16] : memref<1x32xf32, #tpu.memory_space<vmem>>, vector<1x32xf32>
      tpu.vector_store %arg6[%c0_15, %c0_16], %15 {strides = array<i32>} : memref<1x32xf32, #tpu.memory_space<vmem>>, vector<1x32xf32>,
      %cst_17 = arith.constant 0xFF800000 : f32
      %17 = vector.broadcast %cst_17 : f32 to vector<1x32xf32>
      %c0_18 = arith.constant 0 : index
      %c0_19 = arith.constant 0 : index
      %18 = vector.load %arg7[%c0_18, %c0_19] : memref<1x32xf32, #tpu.memory_space<vmem>>, vector<1x32xf32>
      tpu.vector_store %arg7[%c0_18, %c0_19], %17 {strides = array<i32>} : memref<1x32xf32, #tpu.memory_space<vmem>>, vector<1x32xf32>,
    } else {
    }
    %c0 = arith.constant 0 : index
    %c0_1 = arith.constant 0 : index
    %c0_2 = arith.constant 0 : index
    %3 = vector.load %arg2[%c0, %c0_1, %c0_2] : memref<1x32x256xf32, #tpu.memory_space<vmem>>, vector<1x32x256xf32>
    %c0_3 = arith.constant 0 : index
    %c0_4 = arith.constant 0 : index
    %4 = vector.load %arg6[%c0_3, %c0_4] : memref<1x32xf32, #tpu.memory_space<vmem>>, vector<1x32xf32>
    %cst = arith.constant dense<0.000000e+00> : vector<1x32xf32>
    %5 = vector.multi_reduction <add>, %3, %cst [2] : vector<1x32x256xf32> to vector<1x32xf32>
    %6 = arith.addf %4, %5 : vector<1x32xf32>
    %c0_5 = arith.constant 0 : index
    %c0_6 = arith.constant 0 : index
    %7 = vector.load %arg6[%c0_5, %c0_6] : memref<1x32xf32, #tpu.memory_space<vmem>>, vector<1x32xf32>
    tpu.vector_store %arg6[%c0_5, %c0_6], %6 {strides = array<i32>} : memref<1x32xf32, #tpu.memory_space<vmem>>, vector<1x32xf32>,
    %c0_7 = arith.constant 0 : index
    %c0_8 = arith.constant 0 : index
    %8 = vector.load %arg7[%c0_7, %c0_8] : memref<1x32xf32, #tpu.memory_space<vmem>>, vector<1x32xf32>
    %cst_9 = arith.constant dense<0xFF800000> : vector<1x32xf32>
    %9 = vector.multi_reduction <maximumf>, %3, %cst_9 [2] : vector<1x32x256xf32> to vector<1x32xf32>
    %10 = arith.maximumf %8, %9 : vector<1x32xf32>
    %c0_10 = arith.constant 0 : index
    %c0_11 = arith.constant 0 : index
    %11 = vector.load %arg7[%c0_10, %c0_11] : memref<1x32xf32, #tpu.memory_space<vmem>>, vector<1x32xf32>
    tpu.vector_store %arg7[%c0_10, %c0_11], %10 {strides = array<i32>} : memref<1x32xf32, #tpu.memory_space<vmem>>, vector<1x32xf32>,
    %c0_i32_12 = arith.constant 0 : i32
    %12 = arith.cmpi eq, %arg1, %c0_i32_12 : i32
    %13 = arith.extui %12 : i1 to i32
    %c0_i32_13 = arith.constant 0 : i32
    %14 = arith.cmpi ne, %13, %c0_i32_13 : i32
    scf.if %14 {
      %c0_14 = arith.constant 0 : index
      %c0_15 = arith.constant 0 : index
      %15 = vector.load %arg6[%c0_14, %c0_15] : memref<1x32xf32, #tpu.memory_space<vmem>>, vector<1x32xf32>
      %cst_16 = arith.constant 3.906250e-03 : f32
      %16 = vector.broadcast %cst_16 : f32 to vector<1x32xf32>
      %17 = arith.mulf %15, %16 : vector<1x32xf32>
      %c0_17 = arith.constant 0 : index
      %c0_18 = arith.constant 0 : index
      %18 = vector.load %arg7[%c0_17, %c0_18] : memref<1x32xf32, #tpu.memory_space<vmem>>, vector<1x32xf32>
      %c0_19 = arith.constant 0 : index
      %c0_20 = arith.constant 0 : index
      %19 = vector.load %arg3[%c0_19, %c0_20] : memref<32x4xf32, #tpu.memory_space<vmem>>, vector<32x4xf32>
      %c0_21 = arith.constant 0 : index
      %c0_22 = arith.constant 0 : index
      %20 = vector.load %arg4[%c0_21, %c0_22] : memref<4x32xf32, #tpu.memory_space<vmem>>, vector<4x32xf32>
      %cst_23 = arith.constant dense<0.000000e+00> : vector<1x4xf32>
      %21 = tpu.matmul %17, %19, %cst_23 {dimension_numbers = #tpu.dot_dimension_numbers<[1], [0], [0], [1], [0, 0, 1, 1], [], []>} : vector<1x32xf32>, vector<32x4xf32>, vector<1x4xf32> -> vector<1x4xf32>
      %cst_24 = arith.constant 0.000000e+00 : f32
      %22 = vector.broadcast %cst_24 : f32 to vector<1x4xf32>
      %23 = arith.maximumf %21, %22 : vector<1x4xf32>
      %cst_25 = arith.constant dense<0.000000e+00> : vector<1x4xf32>
      %24 = tpu.matmul %18, %19, %cst_25 {dimension_numbers = #tpu.dot_dimension_numbers<[1], [0], [0], [1], [0, 0, 1, 1], [], []>} : vector<1x32xf32>, vector<32x4xf32>, vector<1x4xf32> -> vector<1x4xf32>
      %cst_26 = arith.constant 0.000000e+00 : f32
      %25 = vector.broadcast %cst_26 : f32 to vector<1x4xf32>
      %26 = arith.maximumf %24, %25 : vector<1x4xf32>
      %cst_27 = arith.constant dense<0.000000e+00> : vector<1x32xf32>
      %27 = tpu.matmul %23, %20, %cst_27 {dimension_numbers = #tpu.dot_dimension_numbers<[1], [0], [0], [1], [0, 0, 1, 1], [], []>} : vector<1x4xf32>, vector<4x32xf32>, vector<1x32xf32> -> vector<1x32xf32>
      %cst_28 = arith.constant dense<0.000000e+00> : vector<1x32xf32>
      %28 = tpu.matmul %26, %20, %cst_28 {dimension_numbers = #tpu.dot_dimension_numbers<[1], [0], [0], [1], [0, 0, 1, 1], [], []>} : vector<1x4xf32>, vector<4x32xf32>, vector<1x32xf32> -> vector<1x32xf32>
      %29 = arith.addf %27, %28 : vector<1x32xf32>
      %cst_29 = arith.constant 0.000000e+00 : f32
      %30 = vector.broadcast %cst_29 : f32 to vector<1x32xf32>
      %31 = arith.subf %30, %29 : vector<1x32xf32>
      %32 = math.exp %31 : vector<1x32xf32>
      %cst_30 = arith.constant 1.000000e+00 : f32
      %33 = vector.broadcast %cst_30 : f32 to vector<1x32xf32>
      %34 = arith.addf %33, %32 : vector<1x32xf32>
      %cst_31 = arith.constant 1.000000e+00 : f32
      %35 = vector.broadcast %cst_31 : f32 to vector<1x32xf32>
      %36 = arith.divf %35, %34 : vector<1x32xf32>
      %37 = vector.shape_cast %36 : vector<1x32xf32> to vector<1x1x32xf32>
      %c0_32 = arith.constant 0 : index
      %c0_33 = arith.constant 0 : index
      %c0_34 = arith.constant 0 : index
      %38 = vector.load %arg5[%c0_32, %c0_33, %c0_34] : memref<1x1x32xf32, #tpu.memory_space<vmem>>, vector<1x1x32xf32>
      tpu.vector_store %arg5[%c0_32, %c0_33, %c0_34], %37 {strides = array<i32>} : memref<1x1x32xf32, #tpu.memory_space<vmem>>, vector<1x1x32xf32>,
    } else {
    }
    return
  }
  func.func @transform_0(%arg0: i32, %arg1: i32) -> (i32, i32, i32) {
    %c0_i32 = arith.constant 0 : i32
    %c0_i32_0 = arith.constant 0 : i32
    return %arg0, %c0_i32, %arg1 : i32, i32, i32
  }
  func.func @transform_1(%arg0: i32, %arg1: i32) -> (i32, i32) {
    %c0_i32 = arith.constant 0 : i32
    %c0_i32_0 = arith.constant 0 : i32
    %c0_i32_1 = arith.constant 0 : i32
    return %c0_i32, %c0_i32_0 : i32, i32
  }
  func.func @transform_2(%arg0: i32, %arg1: i32) -> (i32, i32) {
    %c0_i32 = arith.constant 0 : i32
    %c0_i32_0 = arith.constant 0 : i32
    %c0_i32_1 = arith.constant 0 : i32
    return %c0_i32, %c0_i32_0 : i32, i32
  }
  func.func @transform_3(%arg0: i32, %arg1: i32) -> (i32, i32, i32) {
    %c0_i32 = arith.constant 0 : i32
    %c0_i32_0 = arith.constant 0 : i32
    %c0_i32_1 = arith.constant 0 : i32
    return %arg0, %c0_i32, %c0_i32_0 : i32, i32, i32
  }
}

</mosaic_0001>

<bundles_post_ra>
// kernel: channel_attention.1
= control target key start
LH: loop header
LB: loop body
LE: loop exit
PB: predicated region body
PF: predicated region fallthrough
CT: control target
= control target key end

     0   :  { %8 = vsyncpa [#allocation5], 0  ;;  %s1950_s0 = inlined_call_operand.vmem [shape: f32[2,32,256], index: 0, kind: input, shape index: {}]   ;;  %s1951_s1 = inlined_call_operand.vmem [shape: f32[32,4], index: 1, kind: input, shape index: {}]   ;;  %s1952_s2 = inlined_call_operand.vmem [shape: f32[4,32], index: 2, kind: input, shape index: {}]   ;;  %s1953_s3 = inlined_call_operand.hbm [shape: f32[2,1,32], index: 3, kind: output, shape index: {}]  }
   0x1   :  { %10 = vsyncpa [#allocation5 + $0x1], 0  ;;  %s1648_s12 = smov 0   ;;  %s1650_s13 = smov 0  }
   0x2   :  { %s1652_s14 = smov 0   ;;  %s1654_s15 = smov 0  }
   0x3   :  { %s1656_s16 = smov 0   ;;  %s1658_s17 = smov 0  }
   0x4 LB: > { %s1398_s18 = sadd.s32 4294967295, %s1619_s17   ;;  %s1399_s19 = sadd.s32 4294967294, %s1619_s17   ;;  %s1619_s17 = sphi %s1658_s17, %s16_s17   ;;  %s1615_s16 = sphi %s1656_s16, %s1960_s16   ;;  %s1611_s15 = sphi %s1654_s15, %s1959_s15   ;;  %s1607_s14 = sphi %s1652_s14, %s1958_s14   ;;  %s1603_s13 = sphi %s1650_s13, %s1957_s13   ;;  %s1599_s12 = sphi %s1648_s12, %s1956_s12  }
   0x5   : > { %s28_s20 = sadd.s32 1, %s1615_s16  ;;  %s105_s21 = sadd.s32 1, %s1607_s14 }
   0x6   : > { %p30_p0 = scmp.ge.s32.totalorder %s28_s20, 2  ;;  %p115_p1 = scmp.ne.s32.totalorder %s1607_s14, %s1603_s13 }
   0x7   : > { %p116_p2 = scmp.eq.s32.totalorder %s1398_s18, 1  ;;  %p121_p3 = scmp.ne.s32.totalorder %s1603_s13, %s1599_s12 }
   0x8   : > { %s1962_s20 = smov (%p30_p0, %s28_s20), 0  ;;  %p122_p5 = scmp.eq.s32.totalorder %s1399_s19, 1 }
   0x9   : > { %p1688_p4 = por %p116_p2, %p115_p1  ;;  %s102_s23 = ssub.s32 %s1615_s16, %s1962_s20 }
   0xa   : > { %p1402_p6 = scmp.ge.s32.totalorder %s1619_s17, 1  ;;  %p103_p7 = scmp.eq.s32.totalorder %s102_s23, 0 }
   0xb   : > { %p1695_p8 = por %p122_p5, %p121_p3  ;;  %p159_p9 = scmp.lt.s32.totalorder %s1619_s17, 3 }
   0xc   : > { %s1701_s25 = scalar_select %p103_p7, %s1607_s14, %s105_s21  }
   0xd   : > { %p160_p10 = pnand %p1402_p6, %p159_p9 }
   0xe   : > { %p187_p11 = scmp.lt.s32.totalorder (!%p160_p10), %s1611_s15, 1  ;;  %v1621_v16 = vmov (!%p160_p10), 0   ;;  %v228_v17 = vlaneseq (!%p160_p10)  ;;  %v1622_v18 = vmov (!%p160_p10), 1966171168   ;;  %vm200_vm0 = vcmask (!%p160_p10), 253952   ;;  %s184_s21 = sand.u32 (!%p160_p10), 1, %s1603_s13  }
   0xf   : > { %163 = sbr.rel (%p160_p10) target bundleno = 835 (0x343), region = 32  ;;  %1535 = vset.pattern.permute.xlu0 (!%p160_p10), %v1621_v16  ;;  %1536 = vset.pattern.permute.xlu1 (!%p160_p10), %v1621_v16  ;;  %v361_v19 = vunpack.c.l.s4 (!%p160_p10), %v1622_v18  ;;  %vm1626_vm1 = vmmov (!%p160_p10), 0   ;;  %vm575_vm2 = vcmask (!%p160_p10), 130112   ;;  %vm582_vm3 = vcmask (!%p160_p10), 195712   ;;  %s1411_s23 = sshll.u32 (!%p160_p10), %s1611_s15, 4 }
  0x10   : > { %v1709_v20 = vshrl.u32 (!%p160_p10), %v228_v17, 7  ;;  %vm589_vm4 = vcmask (!%p160_p10), 261312   ;;  %vm1009_vm5 = vcmask (!%p160_p10), 261120   ;;  %vm1162_vm6 = vcmask (!%p160_p10), 1043456   ;;  %s1317_s4 = scalar_lea.sflag (!%p160_p10), [#allocation5], %s184_s21 }
  0x11   : > { %v362_v21 = vunpack.c.0.s8 (!%p160_p10), %v361_v19  ;;  %vm1158_vm7 = vcmask (!%p160_p10), 31744  }
  0x12   : > { %v1712_v22 = vsub.s32 (!%p160_p10), 0, %v1709_v20  ;;  %v1715_v23 = vsub.s32 (!%p160_p10), 1, %v1709_v20  ;;  %v1718_v24 = vsub.s32 (!%p160_p10), 2, %v1709_v20  ;;  %v1721_v25 = vsub.s32 (!%p160_p10), 3, %v1709_v20 }
  0x13   : > { %v1724_v26 = vsub.s32 (!%p160_p10), 4, %v1709_v20  ;;  %v1727_v27 = vsub.s32 (!%p160_p10), 5, %v1709_v20  ;;  %v1730_v28 = vsub.s32 (!%p160_p10), 6, %v1709_v20  ;;  %v1733_v29 = vsub.s32 (!%p160_p10), 7, %v1709_v20 }
  0x14   : > { %v1736_v31 = vsub.s32 (!%p160_p10), %v362_v21, %v1709_v20 }
  0x16   : > { %s188_s26 = scalar_select %p187_p11, %s1611_s15, 1 }
  0x17   : > { %s1627_s15 = smov [#allocation4]  }
  0x18   : > { %s1414_s27 = sshll.u32 %s188_s26, 6  ;;  %s185_s26 = scalar_lea.vmem [#allocation4], %s184_s21 }
  0x19   : > { %s194_s30 = scalar_lea.vmem %s1950_s0, %s1414_s27  ;;  %s1329_s27 = sshll.u32 %s185_s26, 4  ;;  %s1904_s27 = int_to_ptr.vmem [resolvable:$true] %s1329_s27 }
  0x1a   : > { %v203_v0 = vld [vmem:[%s194_s30] sm:$0xff]  ;;  %v204_v1 = vld [vmem:[%s194_s30 + $0x8] sm:$0xff]  ;;  %v205_v2 = vld [vmem:[%s194_s30 + $0x10] sm:$0xff]  ;;  %s1541_s5 = scalar_lea.vmem %s1904_s27, 16  ;;  %s1545_s6 = sshll.u32 %s1627_s15, 4  ;;  %s1546_s6 = int_to_ptr.vmem [resolvable:$false] %s1545_s6 }
  0x1b   : > { %v212_v3 = vadd.f32 %v204_v1, %v203_v0  ;;  %v206_v4 = vld [vmem:[%s194_s30 + $0x18] sm:$0xff]  ;;  %v207_v5 = vld [vmem:[%s194_s30 + $0x20] sm:$0xff]  ;;  %v208_v6 = vld [vmem:[%s194_s30 + $0x28] sm:$0xff]  ;;  %v610_v12 = vmax.f32 %v203_v0, %v204_v1  ;;  %p1542_p12 = scmp.ne.s32.totalorder %s1904_s27, %s1541_s5  ;;  %s1547_s7 = scalar_lea.vmem %s1546_s6, 32 }
  0x1c   : > { %v218_v7 = vadd.f32 %v208_v6, %v207_v5  ;;  %v209_v8 = vld [vmem:[%s194_s30 + $0x30] sm:$0xff]  ;;  %v210_v9 = vld [vmem:[%s194_s30 + $0x38] sm:$0xff]  ;;  %v215_v10 = vadd.f32 %v206_v4, %v205_v2  ;;  %v613_v13 = vmax.f32 %v205_v2, %v206_v4  ;;  %v616_v14 = vmax.f32 %v207_v5, %v208_v6  ;;  %s1902_s30 = scalar_lea.hbm %s1953_s3, %s1411_s23  ;;  %p1548_p1 = scmp.lt.s32.totalorder %s1904_s27, %s1546_s6 }
  0x1d   : > { %213 = vadd.xlane.f32.xlu0 %v212_v3  ;;  %v221_v11 = vadd.f32 %v210_v9, %v209_v8  ;;  %v619_v15 = vmax.f32 %v209_v8, %v210_v9  ;;  %p1543_p13 = pnand %p1542_p12, %p1688_p4  ;;  %p1549_p2 = scmp.lt.s32.totalorder %s1547_s7, %s1541_s5 }
  0x1e   : > { %219 = vadd.xlane.f32.xlu1 %v218_v7 }
  0x1f   : > { %p1544_p0 = pneg %p1543_p13  ;;  %p1550_p3 = por %p1549_p2, %p1548_p1 }
  0x21   : > { %216 = vadd.xlane.f32.xlu0 %v215_v10  ;;  %p1551_p5 = pnand %p1550_p3, %p1544_p0 }
  0x22   : > { %222 = vadd.xlane.f32.xlu1 %v221_v11 }
  0x25   : > { %611 = vmax.xlane.f32.xlu0 %v610_v12 }
  0x26   : > { %614 = vmax.xlane.f32.xlu1 %v613_v13 }
  0x29   : > { %617 = vmax.xlane.f32.xlu0 %v616_v14 }
  0x2a   : > { %620 = vmax.xlane.f32.xlu1 %v619_v15 }
  0xaa   : > { %v214_v30 = vpop.xlane.xlu0 %213 }
  0xab   : > { %v220_v32 = vpop.xlane.xlu1 %219  ;;  %v231_v33 = vrot.slane %v214_v30, %v1712_v22  ;;  %v235_v34 = vrot.slane %v214_v30, %v1715_v23  ;;  %v239_v35 = vrot.slane %v214_v30, %v1718_v24  ;;  %v243_v36 = vrot.slane %v214_v30, %v1721_v25 }
  0xac   : > { %v247_v37 = vrot.slane %v214_v30, %v1724_v26  ;;  %v251_v38 = vrot.slane %v214_v30, %v1727_v27  ;;  %v255_v39 = vrot.slane %v214_v30, %v1730_v28  ;;  %v259_v40 = vrot.slane %v214_v30, %v1733_v29 }
  0xad   : > { %v356_v41 = vcombine.low %v231_v33, %v235_v34  ;;  %v357_v42 = vcombine.low %v239_v35, %v243_v36  ;;  %v295_v43 = vrot.slane %v220_v32, %v1712_v22  ;;  %v299_v44 = vrot.slane %v220_v32, %v1715_v23 }
  0xae   : > { %v217_v45 = vpop.xlane.xlu0 %216  ;;  %v358_v46 = vcombine.low %v247_v37, %v251_v38  ;;  %v359_v47 = vcombine.low %v255_v39, %v259_v40  ;;  %v303_v48 = vrot.slane %v220_v32, %v1718_v24  ;;  %v307_v49 = vrot.slane %v220_v32, %v1721_v25 }
  0xaf   : > { %v366_v50 = vrot.slane %v356_v41, %v1736_v31  ;;  %v373_v51 = vrot.slane %v357_v42, %v1736_v31  ;;  %v263_v52 = vrot.slane %v217_v45, %v1712_v22  ;;  %v267_v53 = vrot.slane %v217_v45, %v1715_v23  ;;  %v223_v6 = vpop.xlane.xlu1 %222 }
  0xb0   : > { %v380_v54 = vrot.slane %v358_v46, %v1736_v31  ;;  %v387_v55 = vrot.slane %v359_v47, %v1736_v31  ;;  %v271_v56 = vrot.slane %v217_v45, %v1718_v24  ;;  %v275_v57 = vrot.slane %v217_v45, %v1721_v25 }
  0xb1   : > { %v388_v58 = vcombine.low %v366_v50, %v373_v51  ;;  %v279_v59 = vrot.slane %v217_v45, %v1724_v26  ;;  %v283_v60 = vrot.slane %v217_v45, %v1727_v27  ;;  %v287_v61 = vrot.slane %v217_v45, %v1730_v28 }
  0xb2   : > { %v389_v62 = vcombine.low %v380_v54, %v387_v55  ;;  %v291_v63 = vrot.slane %v217_v45, %v1733_v29  ;;  %v405_v0 = vcombine.low %v263_v52, %v267_v53  ;;  %v406_v1 = vcombine.low %v271_v56, %v275_v57  ;;  %v612_v42 = vpop.xlane.xlu0 %611 }
  0xb3   : > { %v396_v2 = vrot.slane %v388_v58, %v1736_v31  ;;  %v407_v3 = vcombine.low %v279_v59, %v283_v60  ;;  %v311_v4 = vrot.slane %v220_v32, %v1724_v26  ;;  %v315_v5 = vrot.slane %v220_v32, %v1727_v27  ;;  %v615_v59 = vpop.xlane.xlu1 %614 }
  0xb4   : > { %v403_v7 = vrot.slane %v389_v62, %v1736_v31  ;;  %v408_v8 = vcombine.low %v287_v61, %v291_v63  ;;  %v415_v9 = vrot.slane %v405_v0, %v1736_v31  ;;  %v422_v10 = vrot.slane %v406_v1, %v1736_v31 }
  0xb5   : > { %v429_v11 = vrot.slane %v407_v3, %v1736_v31  ;;  %v319_v12 = vrot.slane %v220_v32, %v1730_v28  ;;  %v323_v13 = vrot.slane %v220_v32, %v1733_v29  ;;  %v454_v14 = vcombine.low %v295_v43, %v299_v44 }
  0xb6   : > { %v404_v15 = vcombine.low %v396_v2, %v403_v7  ;;  %v436_v16 = vrot.slane %v408_v8, %v1736_v31  ;;  %v437_v18 = vcombine.low %v415_v9, %v422_v10  ;;  %v455_v19 = vcombine.low %v303_v48, %v307_v49 }
  0xb7   : > { %v456_v21 = vcombine.low %v311_v4, %v315_v5  ;;  %v457_v30 = vcombine.low %v319_v12, %v323_v13  ;;  %v464_v33 = vrot.slane %v454_v14, %v1736_v31  ;;  %v327_v34 = vrot.slane %v223_v6, %v1712_v22 }
  0xb8   : > { %553 = vperm.xlu0 %1535, %v404_v15   ;;  %v438_v35 = vcombine.low %v429_v11, %v436_v16  ;;  %v445_v36 = vrot.slane %v437_v18, %v1736_v31  ;;  %v471_v37 = vrot.slane %v455_v19, %v1736_v31  ;;  %v331_v32 = vrot.slane %v223_v6, %v1715_v23 }
  0xb9   : > { %v478_v38 = vrot.slane %v456_v21, %v1736_v31  ;;  %v485_v39 = vrot.slane %v457_v30, %v1736_v31  ;;  %v335_v40 = vrot.slane %v223_v6, %v1718_v24  ;;  %v339_v41 = vrot.slane %v223_v6, %v1721_v25  ;;  %v618_v30 = vpop.xlane.xlu0 %617 }
  0xba   : > { %v452_v43 = vrot.slane %v438_v35, %v1736_v31  ;;  %v486_v44 = vcombine.low %v464_v33, %v471_v37  ;;  %v343_v45 = vrot.slane %v223_v6, %v1724_v26  ;;  %v347_v46 = vrot.slane %v223_v6, %v1727_v27 }
  0xbb   : > { %v487_v47 = vcombine.low %v478_v38, %v485_v39  ;;  %v351_v48 = vrot.slane %v223_v6, %v1730_v28  ;;  %v355_v49 = vrot.slane %v223_v6, %v1733_v29  ;;  %v503_v50 = vcombine.low %v327_v34, %v331_v32 }
  0xbc   : > { %v453_v51 = vcombine.low %v445_v36, %v452_v43  ;;  %v494_v52 = vrot.slane %v486_v44, %v1736_v31  ;;  %v504_v53 = vcombine.low %v335_v40, %v339_v41  ;;  %v505_v54 = vcombine.low %v343_v45, %v347_v46 }
  0xbd   : > { %v501_v55 = vrot.slane %v487_v47, %v1736_v31  ;;  %v506_v56 = vcombine.low %v351_v48, %v355_v49  ;;  %v513_v57 = vrot.slane %v503_v50, %v1736_v31  ;;  %v629_v58 = vrot.slane %v612_v42, %v1712_v22 }
  0xbe   : > { %556 = vperm.xlu1 %1536, %v453_v51   ;;  %v520_v60 = vrot.slane %v504_v53, %v1736_v31  ;;  %v527_v61 = vrot.slane %v505_v54, %v1736_v31  ;;  %v633_v62 = vrot.slane %v612_v42, %v1715_v23  ;;  %v637_v63 = vrot.slane %v612_v42, %v1718_v24 }
  0xbf   : > { %v502_v0 = vcombine.low %v494_v52, %v501_v55  ;;  %v534_v1 = vrot.slane %v506_v56, %v1736_v31  ;;  %v641_v2 = vrot.slane %v612_v42, %v1721_v25  ;;  %v645_v3 = vrot.slane %v612_v42, %v1724_v26  ;;  %v621_v52 = vpop.xlane.xlu1 %620 }
  0xc0   : > { %v535_v4 = vcombine.low %v513_v57, %v520_v60  ;;  %v649_v5 = vrot.slane %v612_v42, %v1727_v27  ;;  %v653_v6 = vrot.slane %v612_v42, %v1730_v28  ;;  %v657_v7 = vrot.slane %v612_v42, %v1733_v29 }
  0xc1   : > { %v536_v8 = vcombine.low %v527_v61, %v534_v1  ;;  %v754_v9 = vcombine.low %v629_v58, %v633_v62  ;;  %v755_v10 = vcombine.low %v637_v63, %v641_v2  ;;  %v661_v11 = vrot.slane %v615_v59, %v1712_v22 }
  0xc2   : > { %559 = vperm.xlu1 %1536, %v502_v0   ;;  %v543_v12 = vrot.slane %v535_v4, %v1736_v31  ;;  %v756_v13 = vcombine.low %v645_v3, %v649_v5  ;;  %v757_v14 = vcombine.low %v653_v6, %v657_v7  ;;  %v665_v15 = vrot.slane %v615_v59, %v1715_v23 }
  0xc3   : > { %v550_v16 = vrot.slane %v536_v8, %v1736_v31  ;;  %v764_v18 = vrot.slane %v754_v9, %v1736_v31  ;;  %v771_v19 = vrot.slane %v755_v10, %v1736_v31  ;;  %v669_v21 = vrot.slane %v615_v59, %v1718_v24 }
  0xc4   : > { %v778_v33 = vrot.slane %v756_v13, %v1736_v31  ;;  %v785_v34 = vrot.slane %v757_v14, %v1736_v31  ;;  %v673_v35 = vrot.slane %v615_v59, %v1721_v25  ;;  %v677_v36 = vrot.slane %v615_v59, %v1724_v26 }
  0xc5   : > { %v551_v37 = vcombine.low %v543_v12, %v550_v16  ;;  %v786_v32 = vcombine.low %v764_v18, %v771_v19  ;;  %v681_v38 = vrot.slane %v615_v59, %v1727_v27  ;;  %v685_v39 = vrot.slane %v615_v59, %v1730_v28 }
  0xc6   : > { %v787_v40 = vcombine.low %v778_v33, %v785_v34  ;;  %v689_v41 = vrot.slane %v615_v59, %v1733_v29  ;;  %v803_v42 = vcombine.low %v661_v11, %v665_v15  ;;  %v804_v43 = vcombine.low %v669_v21, %v673_v35 }
  0xc7   : > { %562 = vperm.xlu1 %1536, %v551_v37   ;;  %v794_v44 = vrot.slane %v786_v32, %v1736_v31  ;;  %v805_v45 = vcombine.low %v677_v36, %v681_v38  ;;  %v693_v46 = vrot.slane %v618_v30, %v1712_v22  ;;  %v697_v47 = vrot.slane %v618_v30, %v1715_v23  ;;  %v1004_v37 = vld [vmem:[%s1951_s1] sm:$0xff]  ;;  %v1005_v32 = vld [vmem:[%s1951_s1 + $0x8] sm:$0xff] }
  0xc8   : > { %v801_v48 = vrot.slane %v787_v40, %v1736_v31  ;;  %v806_v49 = vcombine.low %v685_v39, %v689_v41  ;;  %v813_v50 = vrot.slane %v803_v42, %v1736_v31  ;;  %v820_v51 = vrot.slane %v804_v43, %v1736_v31 }
  0xc9   : > { %v827_v53 = vrot.slane %v805_v45, %v1736_v31  ;;  %v701_v54 = vrot.slane %v618_v30, %v1718_v24  ;;  %v705_v55 = vrot.slane %v618_v30, %v1721_v25  ;;  %v709_v56 = vrot.slane %v618_v30, %v1724_v26  ;;  %v1007_v45 = vld [vmem:[%s1951_s1 + $0x18] sm:$0xff] }
  0xca   : > { %v802_v57 = vcombine.low %v794_v44, %v801_v48  ;;  %v834_v58 = vrot.slane %v806_v49, %v1736_v31  ;;  %v835_v59 = vcombine.low %v813_v50, %v820_v51  ;;  %v713_v60 = vrot.slane %v618_v30, %v1727_v27  ;;  %v1006_v44 = vld [vmem:[%s1951_s1 + $0x10] sm:$0xff] }
  0xcb   : > { %v717_v61 = vrot.slane %v618_v30, %v1730_v28  ;;  %v721_v62 = vrot.slane %v618_v30, %v1733_v29  ;;  %v852_v63 = vcombine.low %v693_v46, %v697_v47  ;;  %v853_v0 = vcombine.low %v701_v54, %v705_v55 }
  0xcc   : > { %951 = vperm.xlu1 %1536, %v802_v57   ;;  %v836_v1 = vcombine.low %v827_v53, %v834_v58  ;;  %v843_v2 = vrot.slane %v835_v59, %v1736_v31  ;;  %v854_v3 = vcombine.low %v709_v56, %v713_v60  ;;  %v725_v4 = vrot.slane %v621_v52, %v1712_v22 }
  0xcd   : > { %v855_v5 = vcombine.low %v717_v61, %v721_v62  ;;  %v862_v6 = vrot.slane %v852_v63, %v1736_v31  ;;  %v869_v7 = vrot.slane %v853_v0, %v1736_v31  ;;  %v729_v8 = vrot.slane %v621_v52, %v1715_v23 }
  0xce   : > { %v850_v9 = vrot.slane %v836_v1, %v1736_v31  ;;  %v876_v10 = vrot.slane %v854_v3, %v1736_v31  ;;  %v733_v11 = vrot.slane %v621_v52, %v1718_v24  ;;  %v737_v12 = vrot.slane %v621_v52, %v1721_v25 }
  0xcf   : > { %v883_v13 = vrot.slane %v855_v5, %v1736_v31  ;;  %v884_v14 = vcombine.low %v862_v6, %v869_v7  ;;  %v741_v22 = vrot.slane %v621_v52, %v1724_v26  ;;  %v745_v15 = vrot.slane %v621_v52, %v1727_v27 }
  0xd0   : > { %v851_v16 = vcombine.low %v843_v2, %v850_v9  ;;  %v749_v18 = vrot.slane %v621_v52, %v1730_v28  ;;  %v753_v23 = vrot.slane %v621_v52, %v1733_v29  ;;  %v901_v19 = vcombine.low %v725_v4, %v729_v8 }
  0xd1   : > { %v885_v21 = vcombine.low %v876_v10, %v883_v13  ;;  %v892_v30 = vrot.slane %v884_v14, %v1736_v31  ;;  %v902_v33 = vcombine.low %v733_v11, %v737_v12  ;;  %v903_v24 = vcombine.low %v741_v22, %v745_v15 }
  0xd2   : > { %954 = vperm.xlu1 %1536, %v851_v16   ;;  %v904_v25 = vcombine.low %v749_v18, %v753_v23  ;;  %v911_v34 = vrot.slane %v901_v19, %v1736_v31  ;;  %v1623_v39 = vmov 0.0   ;;  %v1624_v41 = vmov 0.0|0.0  }
  0xd3   : > { %v899_v35 = vrot.slane %v885_v21, %v1736_v31  ;;  %v918_v26 = vrot.slane %v902_v33, %v1736_v31  ;;  %v925_v27 = vrot.slane %v903_v24, %v1736_v31  ;;  %201 = vst.msk [vmem:[#allocation2] sm:$0x1] %vm200_vm0, %v1623_v39  ;;  %1461 = vmatprep.subr.bf16.mxu0 %v1624_v41  ;;  %v1625_v47 = vmov -inf   ;;  %v1008_v24 = vld [vmem:[%s1952_s2] sm:$0xf] }
  0xd4   : > { %v932_v28 = vrot.slane %v904_v25, %v1736_v31  ;;  %v1462_v42 = vpack.c.bf16 %v1005_v32, %v1004_v37  ;;  %1467 = vmatprep.subr.bf16.mxu1 %v1624_v41  ;;  %202 = vst.msk [vmem:[#allocation3] sm:$0x1] %vm200_vm0, %v1625_v47  ;;  %v1465_v48 = vpack.c.bf16 %v1007_v45, %v1006_v44  ;;  %v565_v49 = vand.u32 127, %v228_v17 }
  0xd5   : > { %v900_v29 = vcombine.low %v892_v30, %v899_v35  ;;  %v933_v36 = vcombine.low %v911_v34, %v918_v26  ;;  %1437 = vmatprep.mubr.msk.f32.mxu0 %vm1626_vm1, %v1623_v39  ;;  %1448 = vmatprep.mubr.msk.f32.mxu1 %vm1626_vm1, %v1623_v39 }
  0xd6   : > { %v934_v38 = vcombine.low %v925_v27, %v932_v28  ;;  %1463 = vmatpush3.bf16.msra.mxu0 %v1462_v42  ;;  %1469 = vmatpush3.bf16.msra.mxu1 %v1462_v42  ;;  %v570_v50 = vadd.s32 4294967288, %v565_v49  ;;  %v577_v51 = vadd.s32 4294967280, %v565_v49  ;;  %v584_v54 = vadd.s32 4294967272, %v565_v49 }
  0xd7   : > { %957 = vperm.xlu1 %1536, %v900_v29   ;;  %v941_v40 = vrot.slane %v933_v36, %v1736_v31  ;;  %1464 = vmatprep.subr.bf16.mxu0 %v1624_v41  ;;  %v568_v56 = vsub.s32 %v565_v49, %v1709_v20 }
  0xd8   : > { %v948_v43 = vrot.slane %v934_v38, %v1736_v31  ;;  %1470 = vmatprep.subr.bf16.mxu1 %v1624_v41  ;;  %v573_v53 = vsub.s32 %v570_v50, %v1709_v20  ;;  %v580_v55 = vsub.s32 %v577_v51, %v1709_v20  ;;  %v587_v60 = vsub.s32 %v584_v54, %v1709_v20 }
  0xda   : > { %v949_v46 = vcombine.low %v941_v40, %v948_v43  ;;  %1466 = vmatpush3.bf16.msra.mxu0 %v1465_v48  ;;  %1472 = vmatpush3.bf16.msra.mxu1 %v1465_v48  ;;  %v211_v4 = vld [vmem:[#allocation2] sm:$0x1] }
  0xdb   : > { %1456 = vmatprep.subr.mxu0 %v1623_v39  ;;  %1451 = vmatprep.subr.mxu1 %v1623_v39  ;;  %v609_v19 = vld [vmem:[#allocation3] sm:$0x1] }
  0xdc   : > { %960 = vperm.xlu1 %1536, %v949_v46  }
 0x137   : > { %v554_v58 = vpop.permute.xlu0 %553 }
 0x138   : > { %v569_v62 = vrot.slane %v554_v58, %v568_v56 }
 0x13d   : > { %v557_v52 = vpop.permute.xlu1 %556 }
 0x13e   : > { %v574_v59 = vrot.slane %v557_v52, %v573_v53 }
 0x140   : > { %v576_v63 = vsel %vm575_vm2, %v574_v59, %v569_v62 }
 0x141   : > { %v560_v57 = vpop.permute.xlu1 %559 }
 0x142   : > { %v581_v61 = vrot.slane %v560_v57, %v580_v55 }
 0x144   : > { %v583_v1 = vsel %vm582_vm3, %v581_v61, %v576_v63 }
 0x146   : > { %v563_v17 = vpop.permute.xlu1 %562 }
 0x147   : > { %v588_v0 = vrot.slane %v563_v17, %v587_v60 }
 0x149   : > { %v590_v2 = vsel %vm589_vm4, %v588_v0, %v583_v1 }
 0x14a   : > { %v597_v3 = vrot.slane %v590_v2, %v1736_v31 }
 0x14b   : > { %v952_v5 = vpop.permute.xlu1 %951 }
 0x14c   : > { %v604_v6 = vrot.slane %v597_v3, %v1736_v31  ;;  %v965_v13 = vrot.slane %v952_v5, %v568_v56 }
 0x14e   : > { %v606_v20 = vadd.f32 %v604_v6, %v211_v4 }
 0x150   : > { %608 = vst.msk [vmem:[#allocation2] sm:$0x1] %vm200_vm0, %v606_v20 }
 0x151   : > { %v955_v7 = vpop.permute.xlu1 %954 }
 0x152   : > { %v969_v10 = vrot.slane %v955_v7, %v573_v53 }
 0x154   : > { %v970_v22 = vsel %vm575_vm2, %v969_v10, %v965_v13 }
 0x156   : > { %v958_v8 = vpop.permute.xlu1 %957 }
 0x157   : > { %v1001_v9 = vld [vmem:[#allocation2] sm:$0x1]  ;;  %v974_v12 = vrot.slane %v958_v8, %v580_v55 }
 0x158   : > { %v1002_v11 = vmul.f32 0.00390625, %v1001_v9 }
 0x159   : > { %v975_v16 = vsel %vm582_vm3, %v974_v12, %v970_v22 }
 0x15a   : > { %1438 = vmatmul.mubr.msk.f32.vlgmr.msra.gmra.mrb[0].mxu0 %vm1009_vm5, %v1002_v11 }
 0x15b   : > { %v961_v14 = vpop.permute.xlu1 %960  ;;  %1458 = vmatprep.mubr.msk.f32.mxu0 %vm1626_vm1, %v1623_v39  ;;  %1457 = vmatpush3.msk.msra.mxu0 %vm1162_vm6, %v1008_v24 }
 0x15c   : > { %v979_v15 = vrot.slane %v961_v14, %v587_v60 }
 0x15e   : > { %v980_v18 = vsel %vm589_vm4, %v979_v15, %v975_v16 }
 0x15f   : > { %v987_v23 = vrot.slane %v980_v18, %v1736_v31 }
 0x161   : > { %v994_v21 = vrot.slane %v987_v23, %v1736_v31 }
 0x163   : > { %v996_v30 = vmax.f32 %v609_v19, %v994_v21 }
 0x165   : > { %997 = vst.msk [vmem:[#allocation3] sm:$0x1] %vm200_vm0, %v996_v30 }
 0x16c   : > { %v1003_v33 = vld [vmem:[#allocation3] sm:$0x1] }
 0x16d   : > { %1449 = vmatmul.mubr.msk.f32.vlgmr.msra.gmra.mrb[0].mxu1 %vm1009_vm5, %v1003_v33 }
 0x16e   : > { %1453 = vmatprep.mubr.msk.f32.mxu1 %vm1626_vm1, %v1623_v39  ;;  %1452 = vmatpush3.msk.msra.mxu1 %vm1162_vm6, %v1008_v24 }
 0x22d   : > { %v1079_v25 = vpop.f32.mrb[0].mxu0 }
 0x22e   : > { %v1083_v34 = vmax.f32 %v1079_v25, 0.0  ;;  %v1439_v31 = vpop.f32.mrb[1].mxu0 }
 0x230   : > { %1459 = vmatmul.mubr.msk.f32.vlgmr.msra.gmra.mrb[2].mxu0 %vm1158_vm7, %v1083_v34 }
 0x240   : > { %v1153_v35 = vpop.f32.mrb[0].mxu1 }
 0x241   : > { %v1157_v26 = vmax.f32 %v1153_v35, 0.0  ;;  %v1450_v27 = vpop.f32.mrb[1].mxu1 }
 0x243   : > { %1454 = vmatmul.mubr.msk.f32.vlgmr.msra.gmra.mrb[2].mxu1 %vm1158_vm7, %v1157_v26 }
 0x303   : > { %v1305_v28 = vpop.f32.mrb[2].mxu0 }
 0x304   : > { %v1460_v29 = vpop.f32.mrb[3].mxu0 }
 0x316   : > { %v1232_v36 = vpop.f32.mrb[2].mxu1 }
 0x317   : > { %v1306_v37 = vadd.f32 %v1305_v28, %v1232_v36  ;;  %v1455_v32 = vpop.f32.mrb[3].mxu1 }
 0x319   : > { %v1309_v38 = vsub.f32 0.0, %v1306_v37 }
 0x31b   : > { %v1310_v39 = vmul.f32 1.442695, %v1309_v38 }
 0x31d   : > { %1537 = vpow2.f32 %v1310_v39 }
 0x327   : > { %v1538_v40 = vpop.eup %1537 }
 0x328   : > { %v1312_v41 = vadd.f32 1.0, %v1538_v40 }
 0x32a   : > { %1539 = vrcp.f32 %v1312_v41 }
 0x334   : > { %v1540_v42 = vpop.eup %1539 }
 0x335   : > { %1315 = vst.msk [vmem:[%s185_s26] sm:$0x1] %vm200_vm0, %v1540_v42 }
 0x336   : > { %1554 = shalt.err (!%p1551_p5)
}
 0x337   : > { %s1555_s8 = scalar_lea.hbm %s1902_s30, 16  ;;  %s1559_s11 = scalar_lea.hbm %s1953_s3, 32 }
 0x338   : > { %p1556_p6 = scmp.ne.s32.totalorder %s1902_s30, %s1555_s8  ;;  %p1560_p10 = scmp.lt.u32.totalorder %s1902_s30, %s1953_s3 }
 0x339   : > { %p1561_p11 = scmp.lt.u32.totalorder %s1559_s11, %s1555_s8  ;;  %p1563_p13 = scmp.lt.u32.totalorder %s1555_s8, %s1902_s30 }
 0x33a   : > { %p1557_p7 = pnand %p1556_p6, %p1688_p4 }
 0x33b   : > { %p1562_p12 = por %p1561_p11, %p1560_p10 }
 0x33c   : > { %p1558_p9 = pneg %p1557_p7 }
 0x33d   : > { %p1564_p0 = por %p1563_p13, %p1562_p12 }
 0x33f   : > { %p1565_p1 = pnand %p1564_p0, %p1558_p9 }
 0x341   : > { %1568 = shalt.err (!%p1565_p1)
}
 0x342   : > { %1474 = dma.vmem_to_hbm [thread:$0]  (%p1688_p4), %s1904_s27, 16, %s1902_s30, %s1317_s4  }
 0x343 PF: > { %p1480_p2 = scmp.ge.s32.totalorder %s1619_s17, 2  ;;  %s1341_s21 = sand.u32 1, %s1599_s12  }
 0x344   : > { %s1342_s23 = scalar_lea.sflag [#allocation5], %s1341_s21 }
 0x345   : > { %p1477_p3 = pnand %p1480_p2, %p1695_p8 }
 0x347   : > { %1594 = dma.done.wait (!%p1477_p3), %s1342_s23, 16  }
 0x348   : > { %1596 = vsyncadd (!%p1477_p3), %s1342_s23, 4294967280  ;;  %s16_s17 = sadd.s32 1, %s1619_s17   ;;  %s1956_s12 = smov %s1603_s13 }
 0x349   : > { %p13_p5 = scmp.ge.s32.totalorder %s16_s17, 4   ;;  %s1957_s13 = smov %s1607_s14 }
 0x34a   : > { %s1958_s14 = smov %s1701_s25  ;;  %s1959_s15 = smov %s1615_s16 }
 0x34b   : > { %s1960_s16 = smov %s1962_s20  ;;  %15 = sbr.rel (!%p13_p5) target bundleno = 4 (0x4), region = 75 }
 0x352   :  { %1346 = vsyncpa [#allocation5], 1 }
 0x353   :  { %1348 = vsyncpa [#allocation5 + $0x1], 1 }

</bundles_post_ra>
